<compile_context>
chip_gen: v7x
topology: tpu7x:2x2x1
jax: 0.10.0
libtpu: 0.0.40
codegen_flags: <defaults>
</compile_context>

<pallas_src>
import functools

import jax
import jax.numpy as jnp
from jax import lax
from jax.experimental import pallas as pl
from jax.experimental.pallas import tpu as pltpu


# ---------------------------------------------------------------------------
# Single-pair path (the module's forward: zi, zj are 1-D vectors).
# Latency/dispatch bound -- keep it minimal; real-world callers should batch.
# ---------------------------------------------------------------------------
def _ntxent_pair_kernel(zi_ref, zj_ref, out_ref, *, inv_temp):
    # zi_ref / zj_ref: small VMEM tiles; out_ref: (1, 1) SMEM scalar.
    zi = zi_ref[...].astype(jnp.float32)
    zj = zj_ref[...].astype(jnp.float32)

    dot = jnp.sum(zi * zj)
    ssq_i = jnp.sum(zi * zi)
    ssq_j = jnp.sum(zj * zj)

    # Cosine similarity via rsqrt (EUP) instead of sqrt + divide; 1/temp folded into a multiply.
    sim = dot * lax.rsqrt(ssq_i) * lax.rsqrt(ssq_j)
    logit = sim * inv_temp
    # torch.softmax over a single scalar == 1 -> -log(1) == 0; kept explicit for NaN/Inf fidelity.
    out_ref[0, 0] = -jnp.log(jnp.exp(logit - logit))


def contrastive_loss(zi, zj, temp):
    """Pallas implementation of ContrastiveLoss(temp).forward(zi, zj) for 1-D zi, zj."""
    assert zi.ndim == 1 and zj.ndim == 1 and zi.shape == zj.shape
    d = zi.shape[0]
    # Sublane-dense (8, D/8) layout only pays off for large D; for small D, (1, D) already
    # fills the lanes.  Both reshapes of a contiguous 1-D array are metadata-only (no HBM copy).
    rows = 8 if (d % 8 == 0 and d >= 1024) else 1
    cols = d // rows
    zi2 = zi.reshape(rows, cols)
    zj2 = zj.reshape(rows, cols)

    itemsize = jnp.dtype(zi.dtype).itemsize
    out = pl.pallas_call(
        functools.partial(_ntxent_pair_kernel, inv_temp=1.0 / float(temp)),
        out_shape=jax.ShapeDtypeStruct((1, 1), jnp.float32),
        in_specs=[pl.BlockSpec(memory_space=pltpu.VMEM),
                  pl.BlockSpec(memory_space=pltpu.VMEM)],
        out_specs=pl.BlockSpec(memory_space=pltpu.SMEM),
        cost_estimate=pl.CostEstimate(
            flops=6 * d + 16,
            transcendentals=4,
            bytes_accessed=2 * d * itemsize + 4,
        ),
    )(zi2, zj2)
    return out[0, 0]


# ---------------------------------------------------------------------------
# Batched extension: N pairs per pallas_call (the real-world win).
# ---------------------------------------------------------------------------
def _round_up(x, m):
    return ((x + m - 1) // m) * m


def _default_tile_pairs(n, d, itemsize, target_block_bytes=4 << 20):
    # ~4 MiB per input block: amortizes the ~0.35 us per-grid-step overhead (mem-bound kernels
    # reach ~85% of HBM roofline at 512+-wide tiles vs ~29% at tiny tiles) while keeping
    # 2 inputs x 2 pipeline buffers (~16 MiB) comfortably inside v7x's 64 MiB VMEM.
    cap = max(128, (target_block_bytes // max(1, d * itemsize)) // 128 * 128)
    # Prefer >= 2 grid steps when n allows it, so dimension_semantics=("parallel",) can split the
    # grid across both TensorCores on v7x (a single huge block serializes onto one TC).
    want = _round_up(max(1, (n + 1) // 2), 128)
    return int(max(128, min(cap, want)))


def _ntxent_batched_kernel(zi_ref, zj_ref, out_ref, *, inv_temp):
    # zi_ref / zj_ref: (tile_pairs, d) VMEM blocks; out_ref: (1, tile_pairs) lane-dense row.
    zi = zi_ref[...].astype(jnp.float32)
    zj = zj_ref[...].astype(jnp.float32)

    # Three plain lane-reduces (no concat slab: concats materialize a 3x VMEM copy on TPU,
    # and the XLU has slack anyway since the kernel is HBM-bound).
    dot = jnp.sum(zi * zj, axis=1)          # (tile_pairs,)
    ssq_i = jnp.sum(zi * zi, axis=1)
    ssq_j = jnp.sum(zj * zj, axis=1)

    sim = dot * lax.rsqrt(ssq_i) * lax.rsqrt(ssq_j)
    logit = sim * inv_temp
    # softmax over a single scalar == 1 -> loss == 0; kept explicit for NaN/Inf fidelity.
    loss = -jnp.log(jnp.exp(logit - logit))

    # Lane-dense, fully in-bounds store (unmasked vst) -- one 128*k-wide row per grid step.
    out_ref[...] = loss[None, :]


def contrastive_loss_batched(zi, zj, temp, *, tile_pairs=None):
    """Batched extension: zi, zj of shape (N, D); returns (N,) per-pair losses in one pallas_call.

    No wrapper-side stacking or padding: zi / zj stream straight from HBM; the ragged tail of the
    last grid step reads a Pallas-padded block whose garbage lanes are sliced off here.
    """
    assert zi.ndim == 2 and zi.shape == zj.shape
    n, d = zi.shape
    itemsize = jnp.dtype(zi.dtype).itemsize
    if tile_pairs is None:
        tile_pairs = _default_tile_pairs(n, d, itemsize)

    num_tiles = pl.cdiv(n, tile_pairs)
    n_out = num_tiles * tile_pairs           # output rowis fully covered -> no masked writes
    block_bytes = tile_pairs * d * itemsize
    # 2 inputs x 2 pipeline buffers + slack.  Explicit so v5e's 16 MiB scoped default doesn't
    # bite; capped so a user-supplied huge tile still compiles on v7x (64 MiB physical).
    vmem_limit = int(min(max(32 << 20, 4 * block_bytes + (4 << 20)), 120 << 20))

    out = pl.pallas_call(
        functools.partial(_ntxent_batched_kernel, inv_temp=1.0 / float(temp)),
        out_shape=jax.ShapeDtypeStruct((1, n_out), jnp.float32),
        grid=(num_tiles,),
        in_specs=[pl.BlockSpec((tile_pairs, d), lambda i: (i, 0)),
                  pl.BlockSpec((tile_pairs, d), lambda i: (i, 0))],
        out_specs=pl.BlockSpec((1, tile_pairs), lambda i: (0, i)),
        compiler_params=pltpu.CompilerParams(
            dimension_semantics=("parallel",),
            vmem_limit_bytes=vmem_limit,
        ),
        cost_estimate=pl.CostEstimate(
            flops=6 * n * d + 16 * n,
            transcendentals=4 * n,
            bytes_accessed=2 * n * d * itemsize + 4 * n_out,
        ),
    )(zi, zj)
    # Tail lanes (>= n) of the last tile were computed from padded/garbage rows -- drop them.
    # Do NOT reduce over the full padded row upstream of this slice.
    return out[0, :n]


if __name__ == "__main__":
    key = jax.random.PRNGKey(0)
    k1, k2 = jax.random.split(key)

    D = 128            # embedding dimension (lane friendly)
    TEMP = 0.5         # module __init__ arg

    # --- single pair (module forward semantics) ---
    zi = jax.random.normal(k1, (D,), dtype=jnp.float32)
    zj = jax.random.normal(k2, (D,), dtype=jnp.float32)

    loss = jax.block_until_ready(contrastive_loss(zi, zj, TEMP))

    sim = jnp.dot(zi, zj) / (jnp.linalg.norm(zi) * jnp.linalg.norm(zj))
    ref = -jnp.log(jax.nn.softmax((sim / TEMP)[None])[0])
    assert jnp.allclose(loss, ref, atol=1e-6), (loss, ref)

    # --- batched extension (many pairs per pallas_call; exercises the ragged-tail path) ---
    N = 5
    k3, k4 = jax.random.split(jax.random.PRNGKey(1))
    zi_b = jax.random.normal(k3, (N, D), dtype=jnp.float32)
    zj_b = jax.random.normal(k4, (N, D), dtype=jnp.float32)

    losses = jax.block_until_ready(contrastive_loss_batched(zi_b, zj_b, TEMP))

    sims_b = jnp.sum(zi_b * zj_b, axis=1) / (
        jnp.linalg.norm(zi_b, axis=1) * jnp.linalg.norm(zj_b, axis=1))
    logits_b = sims_b / TEMP
    refs_b = -jnp.log(jnp.exp(logits_b - logits_b))      # == 0 for finite inputs
    assert losses.shape == (N,)
    assert jnp.allclose(losses, refs_b, atol=1e-6), (losses, refs_b)

    print("KERNEL_OK")
</pallas_src>

<mosaic_0001>
module attributes {stable_mosaic.version = 11 : i64} {
  func.func @_ntxent_pair_kernel(%arg0: memref<1x128xf32, #tpu.memory_space<vmem>>, %arg1: memref<1x128xf32, #tpu.memory_space<vmem>>, %arg2: memref<1x1xf32, #tpu.memory_space<smem>>) attributes {dimension_semantics = [], scalar_prefetch = 0 : i64, scratch_operands = 0 : i64, tpu.core_type = #tpu.core_type<tc>} {
    %c0 = arith.constant 0 : index
    %c0_0 = arith.constant 0 : index
    %0 = vector.load %arg0[%c0, %c0_0] : memref<1x128xf32, #tpu.memory_space<vmem>>, vector<1x128xf32>
    %c0_1 = arith.constant 0 : index
    %c0_2 = arith.constant 0 : index
    %1 = vector.load %arg1[%c0_1, %c0_2] : memref<1x128xf32, #tpu.memory_space<vmem>>, vector<1x128xf32>
    %2 = arith.mulf %0, %1 : vector<1x128xf32>
    %3 = vector.shape_cast %2 : vector<1x128xf32> to vector<1x1x128xf32>
    %cst = arith.constant dense<0.000000e+00> : vector<1xf32>
    %4 = vector.multi_reduction <add>, %3, %cst [1, 2] : vector<1x1x128xf32> to vector<1xf32>
    %5 = vector.shape_cast %4 : vector<1xf32> to vector<1x1x1xf32>
    %6 = vector.extract %5[0, 0, 0] : f32 from vector<1x1x1xf32>
    %7 = arith.mulf %0, %0 : vector<1x128xf32>
    %8 = vector.shape_cast %7 : vector<1x128xf32> to vector<1x1x128xf32>
    %cst_3 = arith.constant dense<0.000000e+00> : vector<1xf32>
    %9 = vector.multi_reduction <add>, %8, %cst_3 [1, 2] : vector<1x1x128xf32> to vector<1xf32>
    %10 = vector.shape_cast %9 : vector<1xf32> to vector<1x1x1xf32>
    %11 = vector.extract %10[0, 0, 0] : f32 from vector<1x1x1xf32>
    %12 = arith.mulf %1, %1 : vector<1x128xf32>
    %13 = vector.shape_cast %12 : vector<1x128xf32> to vector<1x1x128xf32>
    %cst_4 = arith.constant dense<0.000000e+00> : vector<1xf32>
    %14 = vector.multi_reduction <add>, %13, %cst_4 [1, 2] : vector<1x1x128xf32> to vector<1xf32>
    %15 = vector.shape_cast %14 : vector<1xf32> to vector<1x1x1xf32>
    %16 = vector.extract %15[0, 0, 0] : f32 from vector<1x1x1xf32>
    %17 = math.rsqrt %11 : f32
    %18 = arith.mulf %6, %17 : f32
    %19 = math.rsqrt %16 : f32
    %20 = arith.mulf %18, %19 : f32
    %cst_5 = arith.constant 2.000000e+00 : f32
    %21 = arith.mulf %20, %cst_5 : f32
    %22 = arith.subf %21, %21 : f32
    %23 = math.exp %22 : f32
    %24 = math.log %23 : f32
    %cst_6 = arith.constant 0.000000e+00 : f32
    %25 = arith.subf %cst_6, %24 : f32
    %c0_7 = arith.constant 0 : index
    %c0_8 = arith.constant 0 : index
    %26 = memref.load %arg2[%c0_7, %c0_8] : memref<1x1xf32, #tpu.memory_space<smem>>
    memref.store %25, %arg2[%c0_7, %c0_8] : memref<1x1xf32, #tpu.memory_space<smem>>
    return
  }
}

</mosaic_0001>

<bundles_post_ra>
// kernel: tpu_custom_call.1
= control target key start
LH: loop header
LB: loop body
LE: loop exit
PB: predicated region body
PF: predicated region fallthrough
CT: control target
= control target key end

     0   :  { %7 = vsyncpa [#allocation3], 0  ;;  %s199_s0 = inlined_call_operand.hbm [shape: f32[1,128], index: 0, kind: input, shape index: {}]   ;;  %s200_s1 = inlined_call_operand.vmem [shape: f32[1,128], index: 1, kind: input, shape index: {}]   ;;  %s201_s2 = inlined_call_operand.hbm [shape: f32[1,1], index: 2, kind: output, shape index: {}]  }
   0x1   :  { %8 = vsyncpa [#allocation4], 0  ;;  %s155_s9 = smov [#allocation2]   ;;  %s119_s13 = scalar_lea.hbm %s199_s0, 16 }
   0x2   :  { %s15_s10 = sshll.u32 %s155_s9, 4  ;;  %p120_p0 = scmp.ne.s32.totalorder %s199_s0, %s119_s13  ;;  %s16_s10 = int_to_ptr.vmem [resolvable:$true] %s15_s10 }
   0x3   :  { %p123_p1 = scmp.lt.u32.totalorder %s119_s13, %s199_s0 }
   0x5   :  { %p125_p2 = pnand %p123_p1, %p120_p0 }
   0x7   :  { %128 = shalt.err (!%p125_p2)
}
   0x8   :  { %s129_s18 = scalar_lea.vmem %s16_s10, 16  ;;  %s133_s19 = scalar_lea.vmem %s16_s10, 32 }
   0x9   :  { %p130_p3 = scmp.ne.s32.totalorder %s16_s10, %s129_s18  ;;  %p134_p4 = scmp.lt.s32.totalorder %s16_s10, %s16_s10 }
   0xa   :  { %p135_p5 = scmp.lt.s32.totalorder %s133_s19, %s129_s18 }
   0xc   :  { %p136_p6 = por %p135_p5, %p134_p4 }
   0xe   :  { %p137_p7 = pnand %p136_p6, %p130_p3 }
  0x10   :  { %140 = shalt.err (!%p137_p7)
}
  0x11   :  { %18 = dma.hbm_to_vmem [thread:$0]  %s199_s0, 16, %s16_s10, [#allocation3]  }
  0x12   :  { %151 = dma.done.wait [#allocation3], 16  }
  0x13   :  { %152 = vsyncadd [#allocation3], 4294967280  ;;  %v25_v0 = vld [vmem:[%s200_s1] sm:$0x1]  ;;  %vm27_vm0 = vcmask 1040384   ;;  %s141_s8 = scalar_lea.hbm %s201_s2, 16 }
  0x14   :  { %v24_v1 = vld [vmem:[#allocation2] sm:$0x1]  ;;  %v49_v2 = vmul.f32 %v25_v0, %v25_v0  ;;  %p142_p8 = scmp.ne.s32.totalorder %s201_s2, %s141_s8  ;;  %p145_p9 = scmp.lt.u32.totalorder %s141_s8, %s201_s2 }
  0x15   :  { %v26_v3 = vmul.f32 %v25_v0, %v24_v1  ;;  %v38_v4 = vmul.f32 %v24_v1, %v24_v1 }
  0x16   :  { %v50_v5 = vsel %vm27_vm0, %v49_v2, 0.0  ;;  %p147_p10 = pnand %p145_p9, %p142_p8 }
  0x17   :  { %v28_v6 = vsel %vm27_vm0, %v26_v3, 0.0  ;;  %51 = vadd.xlane.f32.xlu1 %v50_v5  ;;  %v39_v7 = vsel %vm27_vm0, %v38_v4, 0.0 }
  0x18   :  { %29 = vadd.xlane.f32.xlu0 %v28_v6 }
  0x1c   :  { %40 = vadd.xlane.f32.xlu0 %v39_v7 }
  0xa4   :  { %v52_v8 = vpop.xlane.xlu1 %51 }
  0xa5   :  { %v30_v9 = vpop.xlane.xlu0 %29  ;;  %v53_v10 = vrot.slane %v52_v8, 4 }
  0xa6   :  { %v31_v11 = vrot.slane %v30_v9, 4 }
  0xa7   :  { %v54_v12 = vadd.f32 %v53_v10, %v52_v8 }
  0xa8   :  { %v32_v13 = vadd.f32 %v31_v11, %v30_v9 }
  0xa9   :  { %v41_v14 = vpop.xlane.xlu0 %40  ;;  %v55_v15 = vrot.slane %v54_v12, 2 }
  0xaa   :  { %v33_v16 = vrot.slane %v32_v13, 2  ;;  %v42_v17 = vrot.slane %v41_v14, 4 }
  0xab   :  { %v56_v20 = vadd.f32 %v55_v15, %v54_v12 }
  0xac   :  { %v43_v18 = vadd.f32 %v42_v17, %v41_v14  ;;  %v34_v19 = vadd.f32 %v33_v16, %v32_v13 }
  0xad   :  { %v57_v25 = vrot.slane %v56_v20, 1 }
  0xae   :  { %v44_v21 = vrot.slane %v43_v18, 2  ;;  %v35_v22 = vrot.slane %v34_v19, 1 }
  0xaf   :  { %v58_v28 = vadd.f32 %v57_v25, %v56_v20 }
  0xb0   :  { %v45_v23 = vadd.f32 %v44_v21, %v43_v18  ;;  %v36_v24 = vadd.f32 %v35_v22, %v34_v19 }
  0xb2   :  { %95 = vpush %v36_v24  ;;  %v46_v26 = vrot.slane %v45_v23, 1 }
  0xb4   :  { %v47_v27 = vadd.f32 %v46_v26, %v45_v23 }
  0xb6   :  { %97 = vpush %v47_v27 }
  0xb7   :  { %99 = vpush %v58_v28 }
  0xe3   :  { %s96_s0 = spop %95 }
  0xe7   :  { %s98_s1 = spop %97 }
  0xe8   :  { %v60_v29 = vstv %s98_s1  ;;  %s100_s24 = spop %99 }
  0xe9   :  { %111 = vrsqrt.f32 %v60_v29  ;;  %v64_v30 = vstv %s100_s24 }
  0xea   :  { %113 = vrsqrt.f32 %v64_v30 }
  0xf3   :  { %v112_v31 = vpop.eup %111 }
  0xf4   :  { %v114_v32 = vpop.eup %113  ;;  %101 = vpush %v112_v31 }
  0xf5   :  { %103 = vpush %v114_v32 }
 0x125   :  { %s102_s25 = spop %101 }
 0x126   :  { %s63_s26 = smul.f32 %s102_s25, %s96_s0  ;;  %s104_s27 = spop %103 }
 0x128   :  { %s67_s28 = smul.f32 %s104_s27, %s63_s26 }
 0x12a   :  { %s68_s29 = smul.f32 2.0, %s67_s28 }
 0x12c   :  { %s69_s30 = ssub.f32 %s68_s29, %s68_s29 }
 0x12e   :  { %v70_v33 = vstv %s69_s30 }
 0x12f   :  { %v71_v34 = vmul.f32 1.442695, %v70_v33 }
 0x131   :  { %115 = vpow2.f32 %v71_v34 }
 0x13b   :  { %v116_v35 = vpop.eup %115 }
 0x13c   :  { %105 = vpush %v116_v35 }
 0x16d   :  { %s106_s3 = spop %105 }
 0x16e   :  { %v74_v36 = vstv %s106_s3 }
 0x16f   :  { %117 = vlog2.f32 %v74_v36 }
 0x179   :  { %v118_v37 = vpop.eup %117 }
 0x17a   :  { %v76_v38 = vmul.f32 0.6931472, %v118_v37 }
 0x17c   :  { %107 = vpush %v76_v38 }
 0x1ad   :  { %s108_s4 = spop %107 }
 0x1ae   :  { %s78_s5 = ssub.f32 0.0, %s108_s4 }
 0x1b0   :  { %80 = sst [smem:[#allocation5]] %s78_s5 }
 0x1b1   :  { %150 = shalt.err (!%p147_p10)
}
 0x1b2   :  { %s156_s13 = smov [#allocation5]  }
 0x1b3   :  { %88 = dma.smem_to_hbm %s156_s13, 16, %s201_s2, [#allocation4]  }
 0x1b4   :  { %153 = dma.done.wait [#allocation4], 16  }
 0x1b5   :  { %154 = vsyncadd [#allocation4], 4294967280 }
 0x1b6   :  { %92 = sfence }
 0x1b7   :  { %93 = vsyncpa [#allocation3], 1 }
 0x1b8   :  { %94 = vsyncpa [#allocation4], 1 }

</bundles_post_ra>
